<compile_context>
chip_gen: v7x
topology: tpu7x:2x2x1
jax: 0.10.0
libtpu: 0.0.40
codegen_flags: <defaults>
</compile_context>

<pallas_src>
import functools

import jax
import jax.numpy as jnp
from jax.experimental import pallas as pl
from jax.experimental.pallas import tpu as pltpu

_H1, _H2, _H3, _H4 = 512, 512, 128, 64
_BATCH_TILE = 256  # safe on v7x (64 MiB physical / 32 MiB scoped VMEM)


def _round_up(n, m):
    return (n + m - 1) // m * m


def _mlp_kernel(x_ref,
                w1_ref, b1_ref,
                w2_ref, b2_ref,
                w3_ref, b3_ref,
                w4_ref, b4_ref,
                w5_ref, b5_ref,
                out_ref):
    """One batch tile of the 5-layer MLP.

    Weights are bf16 and VMEM-resident across the batch grid; dots run on the
    MXU with f32 accumulation, ReLU on the VPU, and the 64->1 final layer is a
    VPU multiply + cross-lane reduce (avoids a degenerate N=1 MXU pass and the
    masked 1-lane store it would force).
    """
    h = x_ref[...].astype(jnp.bfloat16)

    # Layer 1: z_size -> 512, ReLU
    a = jnp.dot(h, w1_ref[...], preferred_element_type=jnp.float32) + b1_ref[...]
    h = jnp.maximum(a, 0.0).astype(jnp.bfloat16)

    # Layer 2: 512 -> 512, ReLU
    a = jnp.dot(h, w2_ref[...], preferred_element_type=jnp.float32) + b2_ref[...]
    h = jnp.maximum(a, 0.0).astype(jnp.bfloat16)

    # Layer 3: 512 -> 128, ReLU
    a = jnp.dot(h, w3_ref[...], preferred_element_type=jnp.float32) + b3_ref[...]
    h = jnp.maximum(a, 0.0).astype(jnp.bfloat16)

    # Layer 4: 128 -> 64, ReLU
    a = jnp.dot(h, w4_ref[...], preferred_element_type=jnp.float32) + b4_ref[...]
    h4 = jnp.maximum(a, 0.0)                                 # f32 [tb, 64]

    # Layer 5: 64 -> 1 (logit) via VPU mul + lane reduce.
    w5_row = w5_ref[...].astype(jnp.float32)                 # (1, 64) row
    logit = jnp.sum(h4 * w5_row, axis=-1, keepdims=True) + b5_ref[...]

    out_ref[...] = logit.astype(out_ref.dtype)


@jax.jit
def discriminator_latent_forward(x, params):
    """x: [B, z_size] float32. params: flat tuple (w1,b1,...,w5,b5) in f32,
    weights stored as (in_features, out_features), biases as (1, out)."""
    w1, b1, w2, b2, w3, b3, w4, b4, w5, b5 = params
    batch, z_size = x.shape

    # Batch tile: multiple of 8 (sublane), capped at _BATCH_TILE.
    tb = min(_BATCH_TILE, _round_up(batch, 8))
    padded_b = _round_up(batch, tb)
    if padded_b != batch:
        x = jnp.pad(x, ((0, padded_b - batch), (0, 0)))

    # bf16 weights: at small batch the kernel is bound by the weight DMA from
    # HBM; bf16 halves the bytes and is the native MXU input dtype.
    w1b = w1.astype(jnp.bfloat16)
    w2b = w2.astype(jnp.bfloat16)
    w3b = w3.astype(jnp.bfloat16)
    w4b = w4.astype(jnp.bfloat16)
    w5_row = w5.T.astype(jnp.bfloat16)        # (1, 64) row for the VPU path
    b5_2d = b5.reshape(1, 1)

    const2 = lambda i: (0, 0)                 # weights/biases resident in VMEM
    grid = (padded_b // tb,)

    mac = z_size * _H1 + _H1 * _H2 + _H2 * _H3 + _H3 * _H4 + _H4 * 1
    weight_bytes = 2 * (z_size * _H1 + _H1 * _H2 + _H2 * _H3 + _H3 * _H4 + _H4)
    bias_bytes = 4 * (_H1 + _H2 + _H3 + _H4 + 1)
    cost = pl.CostEstimate(
        flops=2 * padded_b * mac,
        transcendentals=0,
        bytes_accessed=weight_bytes + bias_bytes + padded_b * (z_size + 1) * 4,
    )

    out = pl.pallas_call(
        _mlp_kernel,
        out_shape=jax.ShapeDtypeStruct((padded_b, 1), jnp.float32),
        grid=grid,
        in_specs=[
            pl.BlockSpec((tb, z_size), lambda i: (i, 0)),        # x tile
            pl.BlockSpec((z_size, _H1), const2), pl.BlockSpec((1, _H1), const2),
            pl.BlockSpec((_H1, _H2), const2),    pl.BlockSpec((1, _H2), const2),
            pl.BlockSpec((_H2, _H3), const2),    pl.BlockSpec((1, _H3), const2),
            pl.BlockSpec((_H3, _H4), const2),    pl.BlockSpec((1, _H4), const2),
            pl.BlockSpec((1, _H4), const2),      pl.BlockSpec((1, 1), const2),
        ],
        out_specs=pl.BlockSpec((tb, 1), lambda i: (i, 0)),
        compiler_params=pltpu.CompilerParams(
            dimension_semantics=("parallel",)),
        cost_estimate=cost,
    )(x, w1b, b1, w2b, b2, w3b, b3, w4b, b4, w5_row, b5_2d)

    return out[:batch]


def init_params(key, z_size):
    """Deterministic synthetic parameters matching the PyTorch module shapes.

    PyTorch Linear weight is (out, in); we store the transpose (in, out).
    Biases stored as (1, out) rows for lane-wise broadcast in the kernel.
    """
    dims = [(z_size, _H1), (_H1, _H2), (_H2, _H3), (_H3, _H4), (_H4, 1)]
    params = []
    for fan_in, fan_out in dims:
        kw, kb, key = jax.random.split(key, 3)
        scale = 1.0 / jnp.sqrt(jnp.float32(fan_in))
        w = jax.random.uniform(kw, (fan_in, fan_out), jnp.float32, -scale, scale)
        b = jax.random.uniform(kb, (1, fan_out), jnp.float32, -scale, scale)
        params.extend([w, b])
    return tuple(params)


def reference_forward_f32(x, params):
    """Pure-f32 reference (PyTorch semantics)."""
    w1, b1, w2, b2, w3, b3, w4, b4, w5, b5 = params
    h = jnp.maximum(x @ w1 + b1, 0.0)
    h = jnp.maximum(h @ w2 + b2, 0.0)
    h = jnp.maximum(h @ w3 + b3, 0.0)
    h = jnp.maximum(h @ w4 + b4, 0.0)
    return h @ w5 + b5


def reference_forward_bf16(x, params):
    """Plain-JAX reference that mirrors the kernel's bf16-weight / f32-accum
    math, for a tight correctness check."""
    w1, b1, w2, b2, w3, b3, w4, b4, w5, b5 = params

    def layer(h, w, b):
        return jnp.dot(h.astype(jnp.bfloat16), w.astype(jnp.bfloat16),
                       preferred_element_type=jnp.float32) + b

    h = jnp.maximum(layer(x, w1, b1), 0.0)
    h = jnp.maximum(layer(h, w2, b2), 0.0)
    h = jnp.maximum(layer(h, w3, b3), 0.0)
    h = jnp.maximum(layer(h, w4, b4), 0.0)
    w5_row = w5.T.astype(jnp.bfloat16).astype(jnp.float32)   # (1, 64)
    return jnp.sum(h * w5_row, axis=-1, keepdims=True) + b5


if __name__ == "__main__":
    Z_SIZE = 32   # config['z_size']
    BATCH = 8

    key = jax.random.PRNGKey(0)
    kx, kp = jax.random.split(key)
    x = jax.random.normal(kx, (BATCH, Z_SIZE), dtype=jnp.float32)
    params = init_params(kp, Z_SIZE)

    logit = discriminator_latent_forward(x, params)
    logit = jax.block_until_ready(logit)
    assert logit.shape == (BATCH, 1), logit.shape

    ref_bf16 = reference_forward_bf16(x, params)
    max_diff = jnp.max(jnp.abs(logit - ref_bf16))
    assert jnp.allclose(logit, ref_bf16, atol=2e-3, rtol=2e-3), (
        f"max abs diff vs bf16 reference: {max_diff}")

    # Informational only: drift vs full-f32 math comes from the intended
    # bf16 weight/activation cast, not a kernel bug.
    ref_f32 = reference_forward_f32(x, params)
    _ = jnp.max(jnp.abs(logit - ref_f32))

    print("KERNEL_OK")
</pallas_src>

<mosaic_0001>
module attributes {stable_mosaic.version = 11 : i64} {
  func.func @_mlp_kernel(%arg0: i32, %arg1: memref<8x32xf32, #tpu.memory_space<vmem>>, %arg2: memref<32x512xbf16, #tpu.memory_space<vmem>>, %arg3: memref<1x512xf32, #tpu.memory_space<vmem>>, %arg4: memref<512x512xbf16, #tpu.memory_space<vmem>>, %arg5: memref<1x512xf32, #tpu.memory_space<vmem>>, %arg6: memref<512x128xbf16, #tpu.memory_space<vmem>>, %arg7: memref<1x128xf32, #tpu.memory_space<vmem>>, %arg8: memref<128x64xbf16, #tpu.memory_space<vmem>>, %arg9: memref<1x64xf32, #tpu.memory_space<vmem>>, %arg10: memref<1x64xbf16, #tpu.memory_space<vmem>>, %arg11: memref<1x1xf32, #tpu.memory_space<vmem>>, %arg12: memref<8x1xf32, #tpu.memory_space<vmem>>) attributes {dimension_semantics = [#tpu.dimension_semantics<parallel>], iteration_bounds = array<i64: 1>, scalar_prefetch = 0 : i64, scratch_operands = 0 : i64, tpu.core_type = #tpu.core_type<tc>, window_params = [{transform_indices = @transform_0, window_bounds = array<i64: 8, 32>}, {pipeline_mode = #tpu.pipeline_mode<synchronous>, transform_indices = @transform_1, window_bounds = array<i64: 32, 512>}, {pipeline_mode = #tpu.pipeline_mode<synchronous>, transform_indices = @transform_2, window_bounds = array<i64: 1, 512>}, {pipeline_mode = #tpu.pipeline_mode<synchronous>, transform_indices = @transform_3, window_bounds = array<i64: 512, 512>}, {pipeline_mode = #tpu.pipeline_mode<synchronous>, transform_indices = @transform_4, window_bounds = array<i64: 1, 512>}, {pipeline_mode = #tpu.pipeline_mode<synchronous>, transform_indices = @transform_5, window_bounds = array<i64: 512, 128>}, {pipeline_mode = #tpu.pipeline_mode<synchronous>, transform_indices = @transform_6, window_bounds = array<i64: 1, 128>}, {pipeline_mode = #tpu.pipeline_mode<synchronous>, transform_indices = @transform_7, window_bounds = array<i64: 128, 64>}, {pipeline_mode = #tpu.pipeline_mode<synchronous>, transform_indices = @transform_8, window_bounds = array<i64: 1, 64>}, {pipeline_mode = #tpu.pipeline_mode<synchronous>, transform_indices = @transform_9, window_bounds = array<i64: 1, 64>}, {pipeline_mode = #tpu.pipeline_mode<synchronous>, transform_indices = @transform_10, window_bounds = array<i64: 1, 1>}, {transform_indices = @transform_11, window_bounds = array<i64: 8, 1>}]} {
    %c0 = arith.constant 0 : index
    %c0_0 = arith.constant 0 : index
    %0 = vector.load %arg1[%c0, %c0_0] : memref<8x32xf32, #tpu.memory_space<vmem>>, vector<8x32xf32>
    %1 = arith.truncf %0 : vector<8x32xf32> to vector<8x32xbf16>
    %c0_1 = arith.constant 0 : index
    %c0_2 = arith.constant 0 : index
    %2 = vector.load %arg2[%c0_1, %c0_2] : memref<32x512xbf16, #tpu.memory_space<vmem>>, vector<32x512xbf16>
    %cst = arith.constant dense<0.000000e+00> : vector<8x512xf32>
    %3 = tpu.matmul %1, %2, %cst {dimension_numbers = #tpu.dot_dimension_numbers<[1], [0], [0], [1], [0, 0, 1, 1], [], []>} : vector<8x32xbf16>, vector<32x512xbf16>, vector<8x512xf32> -> vector<8x512xf32>
    %c0_3 = arith.constant 0 : index
    %c0_4 = arith.constant 0 : index
    %4 = vector.load %arg3[%c0_3, %c0_4] : memref<1x512xf32, #tpu.memory_space<vmem>>, vector<1x512xf32>
    %5 = vector.broadcast %4 : vector<1x512xf32> to vector<8x512xf32>
    %6 = arith.addf %3, %5 : vector<8x512xf32>
    %cst_5 = arith.constant 0.000000e+00 : f32
    %7 = vector.broadcast %cst_5 : f32 to vector<8x512xf32>
    %8 = arith.maximumf %6, %7 : vector<8x512xf32>
    %9 = arith.truncf %8 : vector<8x512xf32> to vector<8x512xbf16>
    %c0_6 = arith.constant 0 : index
    %c0_7 = arith.constant 0 : index
    %10 = vector.load %arg4[%c0_6, %c0_7] : memref<512x512xbf16, #tpu.memory_space<vmem>>, vector<512x512xbf16>
    %cst_8 = arith.constant dense<0.000000e+00> : vector<8x512xf32>
    %11 = tpu.matmul %9, %10, %cst_8 {dimension_numbers = #tpu.dot_dimension_numbers<[1], [0], [0], [1], [0, 0, 1, 1], [], []>} : vector<8x512xbf16>, vector<512x512xbf16>, vector<8x512xf32> -> vector<8x512xf32>
    %c0_9 = arith.constant 0 : index
    %c0_10 = arith.constant 0 : index
    %12 = vector.load %arg5[%c0_9, %c0_10] : memref<1x512xf32, #tpu.memory_space<vmem>>, vector<1x512xf32>
    %13 = vector.broadcast %12 : vector<1x512xf32> to vector<8x512xf32>
    %14 = arith.addf %11, %13 : vector<8x512xf32>
    %cst_11 = arith.constant 0.000000e+00 : f32
    %15 = vector.broadcast %cst_11 : f32 to vector<8x512xf32>
    %16 = arith.maximumf %14, %15 : vector<8x512xf32>
    %17 = arith.truncf %16 : vector<8x512xf32> to vector<8x512xbf16>
    %c0_12 = arith.constant 0 : index
    %c0_13 = arith.constant 0 : index
    %18 = vector.load %arg6[%c0_12, %c0_13] : memref<512x128xbf16, #tpu.memory_space<vmem>>, vector<512x128xbf16>
    %cst_14 = arith.constant dense<0.000000e+00> : vector<8x128xf32>
    %19 = tpu.matmul %17, %18, %cst_14 {dimension_numbers = #tpu.dot_dimension_numbers<[1], [0], [0], [1], [0, 0, 1, 1], [], []>} : vector<8x512xbf16>, vector<512x128xbf16>, vector<8x128xf32> -> vector<8x128xf32>
    %c0_15 = arith.constant 0 : index
    %c0_16 = arith.constant 0 : index
    %20 = vector.load %arg7[%c0_15, %c0_16] : memref<1x128xf32, #tpu.memory_space<vmem>>, vector<1x128xf32>
    %21 = vector.broadcast %20 : vector<1x128xf32> to vector<8x128xf32>
    %22 = arith.addf %19, %21 : vector<8x128xf32>
    %cst_17 = arith.constant 0.000000e+00 : f32
    %23 = vector.broadcast %cst_17 : f32 to vector<8x128xf32>
    %24 = arith.maximumf %22, %23 : vector<8x128xf32>
    %25 = arith.truncf %24 : vector<8x128xf32> to vector<8x128xbf16>
    %c0_18 = arith.constant 0 : index
    %c0_19 = arith.constant 0 : index
    %26 = vector.load %arg8[%c0_18, %c0_19] : memref<128x64xbf16, #tpu.memory_space<vmem>>, vector<128x64xbf16>
    %cst_20 = arith.constant dense<0.000000e+00> : vector<8x64xf32>
    %27 = tpu.matmul %25, %26, %cst_20 {dimension_numbers = #tpu.dot_dimension_numbers<[1], [0], [0], [1], [0, 0, 1, 1], [], []>} : vector<8x128xbf16>, vector<128x64xbf16>, vector<8x64xf32> -> vector<8x64xf32>
    %c0_21 = arith.constant 0 : index
    %c0_22 = arith.constant 0 : index
    %28 = vector.load %arg9[%c0_21, %c0_22] : memref<1x64xf32, #tpu.memory_space<vmem>>, vector<1x64xf32>
    %29 = vector.broadcast %28 : vector<1x64xf32> to vector<8x64xf32>
    %30 = arith.addf %27, %29 : vector<8x64xf32>
    %cst_23 = arith.constant 0.000000e+00 : f32
    %31 = vector.broadcast %cst_23 : f32 to vector<8x64xf32>
    %32 = arith.maximumf %30, %31 : vector<8x64xf32>
    %c0_24 = arith.constant 0 : index
    %c0_25 = arith.constant 0 : index
    %33 = vector.load %arg10[%c0_24, %c0_25] : memref<1x64xbf16, #tpu.memory_space<vmem>>, vector<1x64xbf16>
    %34 = arith.extf %33 : vector<1x64xbf16> to vector<1x64xf32>
    %35 = vector.broadcast %34 : vector<1x64xf32> to vector<8x64xf32>
    %36 = arith.mulf %32, %35 : vector<8x64xf32>
    %cst_26 = arith.constant dense<0.000000e+00> : vector<8xf32>
    %37 = vector.multi_reduction <add>, %36, %cst_26 [1] : vector<8x64xf32> to vector<8xf32>
    %38 = vector.shape_cast %37 : vector<8xf32> to vector<8x1xf32>
    %c0_27 = arith.constant 0 : index
    %c0_28 = arith.constant 0 : index
    %39 = vector.load %arg11[%c0_27, %c0_28] : memref<1x1xf32, #tpu.memory_space<vmem>>, vector<1x1xf32>
    %40 = vector.broadcast %39 : vector<1x1xf32> to vector<8x1xf32>
    %41 = arith.addf %38, %40 : vector<8x1xf32>
    %c0_29 = arith.constant 0 : index
    %c0_30 = arith.constant 0 : index
    %42 = vector.load %arg12[%c0_29, %c0_30] : memref<8x1xf32, #tpu.memory_space<vmem>>, vector<8x1xf32>
    tpu.vector_store %arg12[%c0_29, %c0_30], %41 {strides = array<i32>} : memref<8x1xf32, #tpu.memory_space<vmem>>, vector<8x1xf32>,
    return
  }
  func.func @transform_0(%arg0: i32) -> (i32, i32) {
    %c0_i32 = arith.constant 0 : i32
    %c0_i32_0 = arith.constant 0 : i32
    return %arg0, %c0_i32 : i32, i32
  }
  func.func @transform_1(%arg0: i32) -> (i32, i32) {
    %c0_i32 = arith.constant 0 : i32
    %c0_i32_0 = arith.constant 0 : i32
    %c0_i32_1 = arith.constant 0 : i32
    return %c0_i32, %c0_i32_0 : i32, i32
  }
  func.func @transform_2(%arg0: i32) -> (i32, i32) {
    %c0_i32 = arith.constant 0 : i32
    %c0_i32_0 = arith.constant 0 : i32
    %c0_i32_1 = arith.constant 0 : i32
    return %c0_i32, %c0_i32_0 : i32, i32
  }
  func.func @transform_3(%arg0: i32) -> (i32, i32) {
    %c0_i32 = arith.constant 0 : i32
    %c0_i32_0 = arith.constant 0 : i32
    %c0_i32_1 = arith.constant 0 : i32
    return %c0_i32, %c0_i32_0 : i32, i32
  }
  func.func @transform_4(%arg0: i32) -> (i32, i32) {
    %c0_i32 = arith.constant 0 : i32
    %c0_i32_0 = arith.constant 0 : i32
    %c0_i32_1 = arith.constant 0 : i32
    return %c0_i32, %c0_i32_0 : i32, i32
  }
  func.func @transform_5(%arg0: i32) -> (i32, i32) {
    %c0_i32 = arith.constant 0 : i32
    %c0_i32_0 = arith.constant 0 : i32
    %c0_i32_1 = arith.constant 0 : i32
    return %c0_i32, %c0_i32_0 : i32, i32
  }
  func.func @transform_6(%arg0: i32) -> (i32, i32) {
    %c0_i32 = arith.constant 0 : i32
    %c0_i32_0 = arith.constant 0 : i32
    %c0_i32_1 = arith.constant 0 : i32
    return %c0_i32, %c0_i32_0 : i32, i32
  }
  func.func @transform_7(%arg0: i32) -> (i32, i32) {
    %c0_i32 = arith.constant 0 : i32
    %c0_i32_0 = arith.constant 0 : i32
    %c0_i32_1 = arith.constant 0 : i32
    return %c0_i32, %c0_i32_0 : i32, i32
  }
  func.func @transform_8(%arg0: i32) -> (i32, i32) {
    %c0_i32 = arith.constant 0 : i32
    %c0_i32_0 = arith.constant 0 : i32
    %c0_i32_1 = arith.constant 0 : i32
    return %c0_i32, %c0_i32_0 : i32, i32
  }
  func.func @transform_9(%arg0: i32) -> (i32, i32) {
    %c0_i32 = arith.constant 0 : i32
    %c0_i32_0 = arith.constant 0 : i32
    %c0_i32_1 = arith.constant 0 : i32
    return %c0_i32, %c0_i32_0 : i32, i32
  }
  func.func @transform_10(%arg0: i32) -> (i32, i32) {
    %c0_i32 = arith.constant 0 : i32
    %c0_i32_0 = arith.constant 0 : i32
    %c0_i32_1 = arith.constant 0 : i32
    return %c0_i32, %c0_i32_0 : i32, i32
  }
  func.func @transform_11(%arg0: i32) -> (i32, i32) {
    %c0_i32 = arith.constant 0 : i32
    %c0_i32_0 = arith.constant 0 : i32
    return %arg0, %c0_i32 : i32, i32
  }
}

</mosaic_0001>

<bundles_post_ra>
// kernel: discriminator_latent_forward.1
= control target key start
LH: loop header
LB: loop body
LE: loop exit
PB: predicated region body
PF: predicated region fallthrough
CT: control target
= control target key end

     0   :  { %v2164_v1 = vmov 0   ;;  %vm113_vm0 = vcmask 261120   ;;  %vm2166_vm1 = vmmov 0   ;;  %vm1633_vm2 = vcmask 523264   ;;  %s2813_s1 = inlined_call_operand.vmem [shape: bf16[32,512], index: 1, kind: input, shape index: {}]   ;;  %s2814_s0 = inlined_call_operand.vmem [shape: f32[8,32], index: 0, kind: input, shape index: {}]   ;;  %s2815_s3 = inlined_call_operand.vmem [shape: bf16[512,512], index: 3, kind: input, shape index: {}]   ;;  %s2816_s5 = inlined_call_operand.vmem [shape: bf16[512,128], index: 5, kind: input, shape index: {}]   ;;  %s2817_s2 = inlined_call_operand.vmem [shape: f32[1,512], index: 2, kind: input, shape index: {}]   ;;  %s2818_s7 = inlined_call_operand.vmem [shape: bf16[128,64], index: 7, kind: input, shape index: {}]   ;;  %s2819_s4 = inlined_call_operand.vmem [shape: f32[1,512], index: 4, kind: input, shape index: {}]   ;;  %s2820_s6 = inlined_call_operand.vmem [shape: f32[1,128], index: 6, kind: input, shape index: {}]   ;;  %s2821_s10 = inlined_call_operand.<no memory space> [shape: f32[1,1], index: 10, kind: input, shape index: {}]   ;;  %s2822_s9 = inlined_call_operand.vmem [shape: bf16[1,64], index: 9, kind: input, shape index: {}]   ;;  %s2823_s8 = inlined_call_operand.vmem [shape: f32[1,64], index: 8, kind: input, shape index: {}]   ;;  %s2824_s11 = inlined_call_operand.vmem [shape: f32[8,1], index: 11, kind: output, shape index: {}]  }
   0x1   :  { %v1920_v0 = vld [vmem:[%s2813_s1 + $0x4] ss:$16 sps:$4 sm:$0xff]   ;;  %149 = vmatprep.mubr.bf16.mxu1 %v2164_v1  ;;  %v1922_v2 = vld [vmem:[%s2813_s1] ss:$16 sps:$4 sm:$0xff]   ;;  %v1928_v6 = vld [vmem:[%s2813_s1 + $0xc] ss:$16 sps:$4 sm:$0xff]  }
   0x2   :  { %117 = vmatprep.subr.bf16.mxu1 %v1920_v0  ;;  %v1923_v3 = vld [vmem:[%s2813_s1 + $0x24] ss:$16 sps:$4 sm:$0xff]   ;;  %v1925_v4 = vld [vmem:[%s2813_s1 + $0x20] ss:$16 sps:$4 sm:$0xff]   ;;  %v1926_v9 = vld [vmem:[%s2813_s1 + $0x8] ss:$16 sps:$4 sm:$0xff]  }
   0x3   :  { %118 = vmatpush1.bf16.msra.mxu1 %v1922_v2  ;;  %v41_v5 = vld [vmem:[%s2814_s0] sm:$0xff]  ;;  %v1931_v10 = vld [vmem:[%s2813_s1 + $0x2c] ss:$16 sps:$4 sm:$0xff]   ;;  %v1929_v13 = vld [vmem:[%s2813_s1 + $0x28] ss:$16 sps:$4 sm:$0xff]   ;;  %vm1645_vm3 = vcmask 7168  }
   0x4   :  { %119 = vmatprep.subr.bf16.mxu1 %v1923_v3  ;;  %v42_v7 = vpack.c.bf16 %v41_v5, %v41_v5  ;;  %v1932_v8 = vld [vmem:[%s2815_s3 + $0x4] ss:$16 sps:$4 sm:$0xff]   ;;  %v1937_v11 = vld [vmem:[%s2815_s3] ss:$16 sps:$4 sm:$0xff]   ;;  %v1936_v16 = vld [vmem:[%s2815_s3 + $0xc] ss:$16 sps:$4 sm:$0xff]  }
   0x5   :  { %997 = vmatprep.subr.bf16.mxu0 %v1932_v8  ;;  %v1938_v12 = vld [vmem:[%s2815_s3 + $0x24] ss:$16 sps:$4 sm:$0xff]   ;;  %v1943_v14 = vld [vmem:[%s2815_s3 + $0x20] ss:$16 sps:$4 sm:$0xff]   ;;  %v1934_v18 = vld [vmem:[%s2815_s3 + $0x8] ss:$16 sps:$4 sm:$0xff]  }
   0x6   :  { %998 = vmatpush1.bf16.msra.mxu0 %v1937_v11  ;;  %v1944_v15 = vld [vmem:[%s2815_s3 + $0x44] ss:$16 sps:$4 sm:$0xff]   ;;  %v1949_v17 = vld [vmem:[%s2815_s3 + $0x40] ss:$16 sps:$4 sm:$0xff]   ;;  %v1942_v20 = vld [vmem:[%s2815_s3 + $0x2c] ss:$16 sps:$4 sm:$0xff]  }
   0x7   :  { %120 = vmatpush1.bf16.msra.mxu1 %v1925_v4  ;;  %999 = vmatprep.subr.bf16.mxu0 %v1938_v12  ;;  %v1950_v19 = vld [vmem:[%s2815_s3 + $0x64] ss:$16 sps:$4 sm:$0xff]   ;;  %v1940_v21 = vld [vmem:[%s2815_s3 + $0x28] ss:$16 sps:$4 sm:$0xff]   ;;  %v1955_v22 = vld [vmem:[%s2815_s3 + $0x60] ss:$16 sps:$4 sm:$0xff]  }
   0x8   :  { %158 = vmatprep.subr.bf16.mxu1 %v1928_v6  ;;  %v1956_v23 = vld [vmem:[%s2815_s3 + $0x84] ss:$16 sps:$4 sm:$0xff]   ;;  %v1948_v24 = vld [vmem:[%s2815_s3 + $0x4c] ss:$16 sps:$4 sm:$0xff]   ;;  %v1961_v25 = vld [vmem:[%s2815_s3 + $0x80] ss:$16 sps:$4 sm:$0xff]  }
   0x9   :  { %v1946_v26 = vld [vmem:[%s2815_s3 + $0x48] ss:$16 sps:$4 sm:$0xff]   ;;  %v1962_v27 = vld [vmem:[%s2815_s3 + $0xa4] ss:$16 sps:$4 sm:$0xff]   ;;  %v1954_v28 = vld [vmem:[%s2815_s3 + $0x6c] ss:$16 sps:$4 sm:$0xff]  }
   0xa   :  { %1659 = vmatmul.mubr.msk.bf16.vlgmr.msra.gmra.mrb[0].mxu1 %vm113_vm0, %v42_v7  ;;  %1000 = vmatpush1.bf16.msra.mxu0 %v1943_v14  ;;  %v1952_v29 = vld [vmem:[%s2815_s3 + $0x68] ss:$16 sps:$4 sm:$0xff]   ;;  %v1967_v30 = vld [vmem:[%s2815_s3 + $0xa0] ss:$16 sps:$4 sm:$0xff]   ;;  %v1968_v31 = vld [vmem:[%s2815_s3 + $0xc4] ss:$16 sps:$4 sm:$0xff]  }
   0xb   :  { %159 = vmatpush1.bf16.msra.mxu1 %v1926_v9  ;;  %190 = vmatprep.mubr.bf16.mxu1 %v2164_v1  ;;  %v1960_v32 = vld [vmem:[%s2815_s3 + $0x8c] ss:$16 sps:$4 sm:$0xff]   ;;  %v1973_v33 = vld [vmem:[%s2815_s3 + $0xc0] ss:$16 sps:$4 sm:$0xff]   ;;  %v1958_v34 = vld [vmem:[%s2815_s3 + $0x88] ss:$16 sps:$4 sm:$0xff]  }
   0xc   :  { %160 = vmatprep.subr.bf16.mxu1 %v1931_v10  ;;  %1001 = vmatprep.subr.bf16.mxu0 %v1944_v15  ;;  %v1974_v35 = vld [vmem:[%s2815_s3 + $0xe4] ss:$16 sps:$4 sm:$0xff]   ;;  %v1966_v36 = vld [vmem:[%s2815_s3 + $0xac] ss:$16 sps:$4 sm:$0xff]   ;;  %v1964_v37 = vld [vmem:[%s2815_s3 + $0xa8] ss:$16 sps:$4 sm:$0xff]  }
   0xd   :  { %v1979_v38 = vld [vmem:[%s2815_s3 + $0xe0] ss:$16 sps:$4 sm:$0xff]   ;;  %v1980_v39 = vld [vmem:[%s2815_s3 + $0x104] ss:$16 sps:$4 sm:$0xff]   ;;  %v1972_v40 = vld [vmem:[%s2815_s3 + $0xcc] ss:$16 sps:$4 sm:$0xff]  }
   0xe   :  { %1002 = vmatpush1.bf16.msra.mxu0 %v1949_v17  ;;  %v1985_v41 = vld [vmem:[%s2815_s3 + $0x100] ss:$16 sps:$4 sm:$0xff]   ;;  %v1970_v42 = vld [vmem:[%s2815_s3 + $0xc8] ss:$16 sps:$4 sm:$0xff]   ;;  %v1986_v43 = vld [vmem:[%s2815_s3 + $0x124] ss:$16 sps:$4 sm:$0xff]  }
   0xf   :  { %161 = vmatpush1.bf16.msra.mxu1 %v1929_v13  ;;  %1003 = vmatprep.subr.bf16.mxu0 %v1950_v19  ;;  %v1978_v44 = vld [vmem:[%s2815_s3 + $0xec] ss:$16 sps:$4 sm:$0xff]   ;;  %v1976_v45 = vld [vmem:[%s2815_s3 + $0xe8] ss:$16 sps:$4 sm:$0xff]   ;;  %v1991_v47 = vld [vmem:[%s2815_s3 + $0x120] ss:$16 sps:$4 sm:$0xff]   ;;  %v53_v13 = vlaneseq }
  0x10   :  { %1079 = vmatprep.subr.bf16.mxu1 %v1936_v16  ;;  %v1984_v46 = vld [vmem:[%s2815_s3 + $0x10c] ss:$16 sps:$4 sm:$0xff]   ;;  %v1992_v48 = vld [vmem:[%s2815_s3 + $0x144] ss:$16 sps:$4 sm:$0xff]   ;;  %v1997_v49 = vld [vmem:[%s2815_s3 + $0x140] ss:$16 sps:$4 sm:$0xff]  }
  0x11   :  { %v1982_v50 = vld [vmem:[%s2815_s3 + $0x108] ss:$16 sps:$4 sm:$0xff]   ;;  %v1998_v51 = vld [vmem:[%s2815_s3 + $0x164] ss:$16 sps:$4 sm:$0xff]   ;;  %v1990_v52 = vld [vmem:[%s2815_s3 + $0x12c] ss:$16 sps:$4 sm:$0xff]  }
  0x12   :  { %1660 = vmatmul.mubr.msk.bf16.vlgmr.msra.gmra.mrb[4].mxu1 %vm113_vm0, %v42_v7  ;;  %1004 = vmatpush1.bf16.msra.mxu0 %v1955_v22  ;;  %v2003_v53 = vld [vmem:[%s2815_s3 + $0x160] ss:$16 sps:$4 sm:$0xff]   ;;  %v1988_v54 = vld [vmem:[%s2815_s3 + $0x128] ss:$16 sps:$4 sm:$0xff]   ;;  %v2004_v55 = vld [vmem:[%s2815_s3 + $0x184] ss:$16 sps:$4 sm:$0xff]  }
  0x13   :  { %1080 = vmatpush1.bf16.msra.mxu1 %v1934_v18  ;;  %1005 = vmatprep.subr.bf16.mxu0 %v1956_v23  ;;  %v1996_v56 = vld [vmem:[%s2815_s3 + $0x14c] ss:$16 sps:$4 sm:$0xff]   ;;  %v2009_v57 = vld [vmem:[%s2815_s3 + $0x180] ss:$16 sps:$4 sm:$0xff]   ;;  %v1994_v58 = vld [vmem:[%s2815_s3 + $0x148] ss:$16 sps:$4 sm:$0xff]  }
  0x14   :  { %1081 = vmatprep.subr.bf16.mxu1 %v1942_v20  ;;  %v2010_v59 = vld [vmem:[%s2815_s3 + $0x1a4] ss:$16 sps:$4 sm:$0xff]   ;;  %v2002_v60 = vld [vmem:[%s2815_s3 + $0x16c] ss:$16 sps:$4 sm:$0xff]   ;;  %v2015_v61 = vld [vmem:[%s2815_s3 + $0x1a0] ss:$16 sps:$4 sm:$0xff]  }
  0x15   :  { %v2000_v62 = vld [vmem:[%s2815_s3 + $0x168] ss:$16 sps:$4 sm:$0xff]   ;;  %v2008_v63 = vld [vmem:[%s2815_s3 + $0x18c] ss:$16 sps:$4 sm:$0xff]   ;;  %v2016_v3 = vld [vmem:[%s2815_s3 + $0x1c4] ss:$16 sps:$4 sm:$0xff]  }
  0x16   :  { %1006 = vmatpush1.bf16.msra.mxu0 %v1961_v25  ;;  %v2006_v0 = vld [vmem:[%s2815_s3 + $0x188] ss:$16 sps:$4 sm:$0xff]   ;;  %v2014_v1 = vld [vmem:[%s2815_s3 + $0x1ac] ss:$16 sps:$4 sm:$0xff]   ;;  %v2021_v6 = vld [vmem:[%s2815_s3 + $0x1c0] ss:$16 sps:$4 sm:$0xff]  }
  0x17   :  { %1082 = vmatpush1.bf16.msra.mxu1 %v1940_v21  ;;  %1007 = vmatprep.subr.bf16.mxu0 %v1962_v27  ;;  %v2012_v2 = vld [vmem:[%s2815_s3 + $0x1a8] ss:$16 sps:$4 sm:$0xff]   ;;  %v2020_v4 = vld [vmem:[%s2815_s3 + $0x1cc] ss:$16 sps:$4 sm:$0xff]   ;;  %v2022_v7 = vld [vmem:[%s2815_s3 + $0x1e4] ss:$16 sps:$4 sm:$0xff]  }
  0x18   :  { %1083 = vmatprep.subr.bf16.mxu1 %v1948_v24  ;;  %v2018_v5 = vld [vmem:[%s2815_s3 + $0x1c8] ss:$16 sps:$4 sm:$0xff]   ;;  %v2026_v8 = vld [vmem:[%s2815_s3 + $0x1ec] ss:$16 sps:$4 sm:$0xff]   ;;  %v2027_v10 = vld [vmem:[%s2815_s3 + $0x1e0] ss:$16 sps:$4 sm:$0xff]  }
  0x19   :  { %v2024_v9 = vld [vmem:[%s2815_s3 + $0x1e8] ss:$16 sps:$4 sm:$0xff]   ;;  %v2030_v11 = vld [vmem:[%s2815_s3 + $0x204] ss:$16 sps:$4 sm:$0xff]   ;;  %v2033_v12 = vld [vmem:[%s2815_s3 + $0x20c] ss:$16 sps:$4 sm:$0xff]  }
  0x1a   :  { %1008 = vmatpush1.bf16.msra.mxu0 %v1967_v30  ;;  %v2454_v14 = vshrl.u32 %v53_v13, 7  ;;  %v2462_v16 = vld [vmem:[%s2817_s2] sm:$0xf]  ;;  %v2090_v13 = vld [vmem:[%s2815_s3 + $0x344] ss:$16 sps:$4 sm:$0xff]  }
  0x1b   :  { %1084 = vmatpush1.bf16.msra.mxu1 %v1946_v26  ;;  %1009 = vmatprep.subr.bf16.mxu0 %v1968_v31  ;;  %v2028_v30 = vld [vmem:[%s2815_s3 + $0x200] ss:$16 sps:$4 sm:$0xff]   ;;  %v2031_v31 = vld [vmem:[%s2815_s3 + $0x208] ss:$16 sps:$4 sm:$0xff]  }
  0x1c   :  { %1085 = vmatprep.subr.bf16.mxu1 %v1954_v28  ;;  %v2457_v15 = vsub.s32 0, %v2454_v14  ;;  %v59_v17 = vsub.s32 1, %v2454_v14  ;;  %v67_v25 = vsub.s32 3, %v2454_v14 }
  0x1e   :  { %1010 = vmatpush1.bf16.msra.mxu0 %v1973_v33  ;;  %v56_v18 = vrot.slane %v2462_v16, %v2457_v15  ;;  %v60_v19 = vrot.slane %v2462_v16, %v59_v17 }
  0x1f   :  { %1086 = vmatpush1.bf16.msra.mxu1 %v1952_v29  ;;  %1011 = vmatprep.subr.bf16.mxu0 %v1974_v35  ;;  %v2039_v35 = vld [vmem:[%s2815_s3 + $0x22c] ss:$16 sps:$4 sm:$0xff]  }
  0x20   :  { %1087 = vmatprep.subr.bf16.mxu1 %v1960_v32  ;;  %v68_v32 = vrot.slane %v2462_v16, %v67_v25 }
  0x22   :  { %1012 = vmatpush1.bf16.msra.mxu0 %v1979_v38  ;;  %v2034_v38 = vld [vmem:[%s2815_s3 + $0x220] ss:$16 sps:$4 sm:$0xff]  }
  0x23   :  { %1088 = vmatpush1.bf16.msra.mxu1 %v1958_v34  ;;  %1013 = vmatprep.subr.bf16.mxu0 %v1980_v39  ;;  %v2036_v34 = vld [vmem:[%s2815_s3 + $0x224] ss:$16 sps:$4 sm:$0xff]   ;;  %v2037_v39 = vld [vmem:[%s2815_s3 + $0x228] ss:$16 sps:$4 sm:$0xff]  }
  0x24   :  { %1089 = vmatprep.subr.bf16.mxu1 %v1966_v36 }
  0x26   :  { %1014 = vmatpush1.bf16.msra.mxu0 %v1985_v41 }
  0x27   :  { %1090 = vmatpush1.bf16.msra.mxu1 %v1964_v37  ;;  %1015 = vmatprep.subr.bf16.mxu0 %v1986_v43  ;;  %v2045_v43 = vld [vmem:[%s2815_s3 + $0x24c] ss:$16 sps:$4 sm:$0xff]  }
  0x28   :  { %1091 = vmatprep.subr.bf16.mxu1 %v1972_v40 }
  0x2a   :  { %1016 = vmatpush1.bf16.msra.mxu0 %v1991_v47  ;;  %v2043_v47 = vld [vmem:[%s2815_s3 + $0x248] ss:$16 sps:$4 sm:$0xff]  }
  0x2b   :  { %1092 = vmatpush1.bf16.msra.mxu1 %v1970_v42  ;;  %1017 = vmatprep.subr.bf16.mxu0 %v1992_v48  ;;  %v2042_v42 = vld [vmem:[%s2815_s3 + $0x244] ss:$16 sps:$4 sm:$0xff]  }
  0x2c   :  { %1093 = vmatprep.subr.bf16.mxu1 %v1978_v44 }
  0x2e   :  { %1018 = vmatpush1.bf16.msra.mxu0 %v1997_v49  ;;  %v2048_v49 = vld [vmem:[%s2815_s3 + $0x264] ss:$16 sps:$4 sm:$0xff]  }
  0x2f   :  { %1094 = vmatpush1.bf16.msra.mxu1 %v1976_v45  ;;  %1019 = vmatprep.subr.bf16.mxu0 %v1998_v51  ;;  %v2046_v51 = vld [vmem:[%s2815_s3 + $0x260] ss:$16 sps:$4 sm:$0xff]  }
  0x30   :  { %1095 = vmatprep.subr.bf16.mxu1 %v1984_v46  ;;  %v2040_v46 = vld [vmem:[%s2815_s3 + $0x240] ss:$16 sps:$4 sm:$0xff]  }
  0x32   :  { %1020 = vmatpush1.bf16.msra.mxu0 %v2003_v53  ;;  %v2054_v53 = vld [vmem:[%s2815_s3 + $0x284] ss:$16 sps:$4 sm:$0xff]  }
  0x33   :  { %1096 = vmatpush1.bf16.msra.mxu1 %v1982_v50  ;;  %1021 = vmatprep.subr.bf16.mxu0 %v2004_v55  ;;  %v2051_v50 = vld [vmem:[%s2815_s3 + $0x26c] ss:$16 sps:$4 sm:$0xff]   ;;  %v2052_v55 = vld [vmem:[%s2815_s3 + $0x280] ss:$16 sps:$4 sm:$0xff]  }
  0x34   :  { %1097 = vmatprep.subr.bf16.mxu1 %v1990_v52  ;;  %v2049_v52 = vld [vmem:[%s2815_s3 + $0x268] ss:$16 sps:$4 sm:$0xff]  }
  0x36   :  { %1022 = vmatpush1.bf16.msra.mxu0 %v2009_v57  ;;  %v2060_v57 = vld [vmem:[%s2815_s3 + $0x2a4] ss:$16 sps:$4 sm:$0xff]  }
  0x37   :  { %1098 = vmatpush1.bf16.msra.mxu1 %v1988_v54  ;;  %1023 = vmatprep.subr.bf16.mxu0 %v2010_v59  ;;  %v2057_v54 = vld [vmem:[%s2815_s3 + $0x28c] ss:$16 sps:$4 sm:$0xff]   ;;  %v2058_v59 = vld [vmem:[%s2815_s3 + $0x2a0] ss:$16 sps:$4 sm:$0xff]  }
  0x38   :  { %1099 = vmatprep.subr.bf16.mxu1 %v1996_v56  ;;  %v2055_v56 = vld [vmem:[%s2815_s3 + $0x288] ss:$16 sps:$4 sm:$0xff]  }
  0x3a   :  { %1024 = vmatpush1.bf16.msra.mxu0 %v2015_v61  ;;  %v2066_v61 = vld [vmem:[%s2815_s3 + $0x2c4] ss:$16 sps:$4 sm:$0xff]  }
  0x3b   :  { %1100 = vmatpush1.bf16.msra.mxu1 %v1994_v58  ;;  %1025 = vmatprep.subr.bf16.mxu0 %v2016_v3  ;;  %v2063_v58 = vld [vmem:[%s2815_s3 + $0x2ac] ss:$16 sps:$4 sm:$0xff]   ;;  %v2070_v3 = vld [vmem:[%s2815_s3 + $0x2e0] ss:$16 sps:$4 sm:$0xff]  }
  0x3c   :  { %1101 = vmatprep.subr.bf16.mxu1 %v2002_v60  ;;  %v2061_v60 = vld [vmem:[%s2815_s3 + $0x2a8] ss:$16 sps:$4 sm:$0xff]  }
  0x3e   :  { %1026 = vmatpush1.bf16.msra.mxu0 %v2021_v6  ;;  %v2081_v6 = vld [vmem:[%s2815_s3 + $0x30c] ss:$16 sps:$4 sm:$0xff]  }
  0x3f   :  { %1102 = vmatpush1.bf16.msra.mxu1 %v2000_v62  ;;  %1027 = vmatprep.subr.bf16.mxu0 %v2022_v7  ;;  %v2069_v62 = vld [vmem:[%s2815_s3 + $0x2cc] ss:$16 sps:$4 sm:$0xff]   ;;  %v2076_v7 = vld [vmem:[%s2815_s3 + $0x300] ss:$16 sps:$4 sm:$0xff]  }
  0x40   :  { %1103 = vmatprep.subr.bf16.mxu1 %v2008_v63  ;;  %v2064_v63 = vld [vmem:[%s2815_s3 + $0x2c0] ss:$16 sps:$4 sm:$0xff]  }
  0x42   :  { %1028 = vmatpush1.bf16.msra.mxu0 %v2027_v10  ;;  %v2087_v10 = vld [vmem:[%s2815_s3 + $0x32c] ss:$16 sps:$4 sm:$0xff]  }
  0x43   :  { %1104 = vmatpush1.bf16.msra.mxu1 %v2006_v0  ;;  %1038 = vmatprep.subr.bf16.mxu0 %v2030_v11  ;;  %v2067_v0 = vld [vmem:[%s2815_s3 + $0x2c8] ss:$16 sps:$4 sm:$0xff]   ;;  %v2082_v11 = vld [vmem:[%s2815_s3 + $0x320] ss:$16 sps:$4 sm:$0xff]  }
  0x44   :  { %1105 = vmatprep.subr.bf16.mxu1 %v2014_v1  ;;  %v2072_v1 = vld [vmem:[%s2815_s3 + $0x2e4] ss:$16 sps:$4 sm:$0xff]  }
  0x47   :  { %1106 = vmatpush1.bf16.msra.mxu1 %v2012_v2  ;;  %v2075_v2 = vld [vmem:[%s2815_s3 + $0x2ec] ss:$16 sps:$4 sm:$0xff]  }
  0x48   :  { %1107 = vmatprep.subr.bf16.mxu1 %v2020_v4  ;;  %v2073_v4 = vld [vmem:[%s2815_s3 + $0x2e8] ss:$16 sps:$4 sm:$0xff]  }
  0x4b   :  { %1108 = vmatpush1.bf16.msra.mxu1 %v2018_v5  ;;  %v2078_v5 = vld [vmem:[%s2815_s3 + $0x304] ss:$16 sps:$4 sm:$0xff]  }
  0x4c   :  { %1109 = vmatprep.subr.bf16.mxu1 %v2026_v8  ;;  %v2079_v8 = vld [vmem:[%s2815_s3 + $0x308] ss:$16 sps:$4 sm:$0xff]  }
  0x4f   :  { %1110 = vmatpush1.bf16.msra.mxu1 %v2024_v9  ;;  %v2084_v9 = vld [vmem:[%s2815_s3 + $0x324] ss:$16 sps:$4 sm:$0xff]  }
  0x50   :  { %1120 = vmatprep.subr.bf16.mxu1 %v2033_v12  ;;  %v2085_v12 = vld [vmem:[%s2815_s3 + $0x328] ss:$16 sps:$4 sm:$0xff]  }
  0xdd   :  { %v151_v20 = vpop.f32.mrb[0].mxu1 }
  0xde   :  { %v152_v21 = vadd.f32 %v151_v20, %v56_v18  ;;  %v153_v22 = vpop.f32.mrb[1].mxu1  ;;  %v2093_v18 = vld [vmem:[%s2815_s3 + $0x34c] ss:$16 sps:$4 sm:$0xff]   ;;  %v2091_v20 = vld [vmem:[%s2815_s3 + $0x348] ss:$16 sps:$4 sm:$0xff]  }
  0xdf   :  { %v154_v23 = vadd.f32 %v153_v22, %v60_v19  ;;  %v155_v24 = vpop.f32.mrb[2].mxu1  ;;  %v2088_v19 = vld [vmem:[%s2815_s3 + $0x340] ss:$16 sps:$4 sm:$0xff]   ;;  %v2099_v22 = vld [vmem:[%s2815_s3 + $0x36c] ss:$16 sps:$4 sm:$0xff]  }
  0xe0   :  { %v199_v26 = vmax.f32 %v152_v21, 0.0  ;;  %v156_v27 = vpop.f32.mrb[3].mxu1  ;;  %v2096_v21 = vld [vmem:[%s2815_s3 + $0x364] ss:$16 sps:$4 sm:$0xff]   ;;  %v2097_v24 = vld [vmem:[%s2815_s3 + $0x368] ss:$16 sps:$4 sm:$0xff]  }
  0xe1   :  { %v200_v28 = vmax.f32 %v154_v23, 0.0  ;;  %v2094_v23 = vld [vmem:[%s2815_s3 + $0x360] ss:$16 sps:$4 sm:$0xff]   ;;  %v2105_v27 = vld [vmem:[%s2815_s3 + $0x38c] ss:$16 sps:$4 sm:$0xff]  }
  0xe2   :  { %v203_v33 = vpack.c.bf16 %v199_v26, %v199_v26  ;;  %v2102_v26 = vld [vmem:[%s2815_s3 + $0x384] ss:$16 sps:$4 sm:$0xff]  }
  0xe3   :  { %v204_v29 = vpack.c.bf16 %v200_v28, %v200_v28  ;;  %v2100_v28 = vld [vmem:[%s2815_s3 + $0x380] ss:$16 sps:$4 sm:$0xff]  }
  0xe5   :  { %1029 = vmatprep.mubr.bf16.mxu0 %v204_v29  ;;  %1111 = vmatprep.mubr.bf16.mxu1 %v204_v29  ;;  %v2486_v36 = vpop.f32.mrb[4].mxu1  ;;  %v2103_v29 = vld [vmem:[%s2815_s3 + $0x388] ss:$16 sps:$4 sm:$0xff]  }
  0xe6   :  { %1030 = vmatmul.mubr.bf16.vlgmr.msra.gmra.mrb[0].mxu0 %v203_v33  ;;  %1112 = vmatmul.mubr.bf16.vlgmr.msra.gmra.mrb[8].mxu1 %v203_v33  ;;  %v194_v37 = vpop.f32.mrb[5].mxu1  ;;  %v2106_v33 = vld [vmem:[%s2815_s3 + $0x3a0] ss:$16 sps:$4 sm:$0xff]  }
  0xe7   :  { %1039 = vmatpush1.bf16.msra.mxu0 %v2028_v30  ;;  %1121 = vmatpush1.bf16.msra.mxu1 %v2031_v31  ;;  %v195_v40 = vadd.f32 %v194_v37, %v68_v32  ;;  %v196_v41 = vpop.f32.mrb[6].mxu1  ;;  %v63_v30 = vsub.s32 2, %v2454_v14  ;;  %v2108_v31 = vld [vmem:[%s2815_s3 + $0x3a4] ss:$16 sps:$4 sm:$0xff]   ;;  %v2111_v32 = vld [vmem:[%s2815_s3 + $0x3ac] ss:$16 sps:$4 sm:$0xff]  }
  0xe8   :  { %1040 = vmatprep.subr.bf16.mxu0 %v2036_v34  ;;  %1122 = vmatprep.subr.bf16.mxu1 %v2039_v35  ;;  %v197_v44 = vpop.f32.mrb[7].mxu1  ;;  %v2109_v34 = vld [vmem:[%s2815_s3 + $0x3a8] ss:$16 sps:$4 sm:$0xff]   ;;  %v2114_v37 = vld [vmem:[%s2815_s3 + $0x3c4] ss:$16 sps:$4 sm:$0xff]  }
  0xe9   :  { %v202_v45 = vmax.f32 %v195_v40, 0.0  ;;  %v64_v35 = vrot.slane %v2462_v16, %v63_v30  ;;  %v2115_v16 = vld [vmem:[%s2815_s3 + $0x3c8] ss:$16 sps:$4 sm:$0xff]   ;;  %v2120_v41 = vld [vmem:[%s2815_s3 + $0x3e4] ss:$16 sps:$4 sm:$0xff]  }
  0xea   :  { %v2156_v14 = vld [vmem:[%s2818_s7] sm:$0xff]  }
  0xeb   :  { %1041 = vmatpush1.bf16.msra.mxu0 %v2034_v38  ;;  %1123 = vmatpush1.bf16.msra.mxu1 %v2037_v39  ;;  %v206_v48 = vpack.c.bf16 %v202_v45, %v202_v45  ;;  %v2117_v38 = vld [vmem:[%s2815_s3 + $0x3cc] ss:$16 sps:$4 sm:$0xff]   ;;  %v2112_v39 = vld [vmem:[%s2815_s3 + $0x3c0] ss:$16 sps:$4 sm:$0xff]   ;;  %v193_v40 = vadd.f32 %v2486_v36, %v64_v35  ;;  %v2121_v36 = vld [vmem:[%s2815_s3 + $0x3e8] ss:$16 sps:$4 sm:$0xff]  }
  0xec   :  { %1042 = vmatprep.subr.bf16.mxu0 %v2042_v42  ;;  %1124 = vmatprep.subr.bf16.mxu1 %v2045_v43  ;;  %v2123_v42 = vld [vmem:[%s2815_s3 + $0x3ec] ss:$16 sps:$4 sm:$0xff]   ;;  %v2118_v43 = vld [vmem:[%s2815_s3 + $0x3e0] ss:$16 sps:$4 sm:$0xff]  }
  0xed   :  { %1070 = vmatprep.mubr.bf16.mxu0 %v206_v48  ;;  %1152 = vmatprep.mubr.bf16.mxu1 %v206_v48  ;;  %v201_v44 = vmax.f32 %v193_v40, 0.0  ;;  %v2124_v45 = vld [vmem:[%s2816_s5 + $0x40] sm:$0xff]  }
  0xee   :  { %v2127_v48 = vld [vmem:[%s2816_s5 + $0x80] sm:$0xff]  }
  0xef   :  { %1043 = vmatpush1.bf16.msra.mxu0 %v2040_v46  ;;  %1125 = vmatpush1.bf16.msra.mxu1 %v2043_v47  ;;  %v2125_v46 = vld [vmem:[%s2816_s5 + $0xc0] sm:$0xff]  }
  0xf0   :  { %1044 = vmatprep.subr.bf16.mxu0 %v2048_v49  ;;  %1126 = vmatprep.subr.bf16.mxu1 %v2051_v50  ;;  %v2126_v47 = vld [vmem:[%s2816_s5] sm:$0xff]   ;;  %v205_v49 = vpack.c.bf16 %v201_v44, %v201_v44  ;;  %v2128_v50 = vld [vmem:[%s2816_s5 + $0x48] sm:$0xff]   ;;  %v2159_v44 = vld [vmem:[%s2818_s7 + $0x18] sm:$0xff]  }
  0xf3   :  { %1045 = vmatpush1.bf16.msra.mxu0 %v2046_v51  ;;  %1127 = vmatpush1.bf16.msra.mxu1 %v2049_v52  ;;  %v2129_v51 = vld [vmem:[%s2816_s5 + $0xc8] sm:$0xff]  }
  0xf4   :  { %1046 = vmatprep.subr.bf16.mxu0 %v2054_v53  ;;  %1128 = vmatprep.subr.bf16.mxu1 %v2057_v54  ;;  %v2130_v52 = vld [vmem:[%s2816_s5 + $0x8] sm:$0xff]   ;;  %v2132_v54 = vld [vmem:[%s2816_s5 + $0x50] sm:$0xff]  }
  0xf5   :  { %v2131_v53 = vld [vmem:[%s2816_s5 + $0x88] sm:$0xff]  }
  0xf7   :  { %1047 = vmatpush1.bf16.msra.mxu0 %v2052_v55  ;;  %1129 = vmatpush1.bf16.msra.mxu1 %v2055_v56  ;;  %v2133_v55 = vld [vmem:[%s2816_s5 + $0xd0] sm:$0xff]  }
  0xf8   :  { %1048 = vmatprep.subr.bf16.mxu0 %v2060_v57  ;;  %1130 = vmatprep.subr.bf16.mxu1 %v2063_v58  ;;  %v2134_v56 = vld [vmem:[%s2816_s5 + $0x10] sm:$0xff]   ;;  %v2136_v58 = vld [vmem:[%s2816_s5 + $0x58] sm:$0xff]  }
  0xf9   :  { %v2135_v57 = vld [vmem:[%s2816_s5 + $0x90] sm:$0xff]  }
  0xfb   :  { %1049 = vmatpush1.bf16.msra.mxu0 %v2058_v59  ;;  %1131 = vmatpush1.bf16.msra.mxu1 %v2061_v60  ;;  %v2137_v59 = vld [vmem:[%s2816_s5 + $0xd8] sm:$0xff]  }
  0xfc   :  { %1050 = vmatprep.subr.bf16.mxu0 %v2066_v61  ;;  %1132 = vmatprep.subr.bf16.mxu1 %v2069_v62  ;;  %v2138_v60 = vld [vmem:[%s2816_s5 + $0x18] sm:$0xff]   ;;  %v2140_v62 = vld [vmem:[%s2816_s5 + $0x60] sm:$0xff]  }
  0xfd   :  { %v2139_v61 = vld [vmem:[%s2816_s5 + $0x98] sm:$0xff]  }
  0xff   :  { %1051 = vmatpush1.bf16.msra.mxu0 %v2064_v63  ;;  %1133 = vmatpush1.bf16.msra.mxu1 %v2067_v0  ;;  %v2141_v63 = vld [vmem:[%s2816_s5 + $0xe0] sm:$0xff]  }
 0x100   :  { %1052 = vmatprep.subr.bf16.mxu0 %v2072_v1  ;;  %1134 = vmatprep.subr.bf16.mxu1 %v2075_v2  ;;  %v2142_v0 = vld [vmem:[%s2816_s5 + $0x20] sm:$0xff]   ;;  %v2144_v2 = vld [vmem:[%s2816_s5 + $0x68] sm:$0xff]  }
 0x101   :  { %v2143_v1 = vld [vmem:[%s2816_s5 + $0xa0] sm:$0xff]  }
 0x103   :  { %1053 = vmatpush1.bf16.msra.mxu0 %v2070_v3  ;;  %1135 = vmatpush1.bf16.msra.mxu1 %v2073_v4  ;;  %v2145_v3 = vld [vmem:[%s2816_s5 + $0xe8] sm:$0xff]  }
 0x104   :  { %1054 = vmatprep.subr.bf16.mxu0 %v2078_v5  ;;  %1136 = vmatprep.subr.bf16.mxu1 %v2081_v6  ;;  %v2146_v4 = vld [vmem:[%s2816_s5 + $0x28] sm:$0xff]   ;;  %v2148_v6 = vld [vmem:[%s2816_s5 + $0x70] sm:$0xff]  }
 0x105   :  { %v2147_v5 = vld [vmem:[%s2816_s5 + $0xa8] sm:$0xff]  }
 0x107   :  { %1055 = vmatpush1.bf16.msra.mxu0 %v2076_v7  ;;  %1137 = vmatpush1.bf16.msra.mxu1 %v2079_v8  ;;  %v2149_v7 = vld [vmem:[%s2816_s5 + $0xf0] sm:$0xff]  }
 0x108   :  { %1056 = vmatprep.subr.bf16.mxu0 %v2084_v9  ;;  %1138 = vmatprep.subr.bf16.mxu1 %v2087_v10  ;;  %v2150_v8 = vld [vmem:[%s2816_s5 + $0x30] sm:$0xff]   ;;  %v2152_v10 = vld [vmem:[%s2816_s5 + $0x78] sm:$0xff]  }
 0x109   :  { %v2151_v9 = vld [vmem:[%s2816_s5 + $0xb0] sm:$0xff]  }
 0x10b   :  { %1057 = vmatpush1.bf16.msra.mxu0 %v2082_v11  ;;  %1139 = vmatpush1.bf16.msra.mxu1 %v2085_v12  ;;  %v2153_v11 = vld [vmem:[%s2816_s5 + $0xf8] sm:$0xff]  }
 0x10c   :  { %1058 = vmatprep.subr.bf16.mxu0 %v2090_v13  ;;  %1140 = vmatprep.subr.bf16.mxu1 %v2093_v18  ;;  %v2154_v12 = vld [vmem:[%s2816_s5 + $0x38] sm:$0xff]   ;;  %v2165_v18 = vmov 0.0  }
 0x10d   :  { %v2155_v13 = vld [vmem:[%s2816_s5 + $0xb8] sm:$0xff]  }
 0x10f   :  { %1059 = vmatpush1.bf16.msra.mxu0 %v2088_v19  ;;  %1141 = vmatpush1.bf16.msra.mxu1 %v2091_v20  ;;  %v335_v19 = vld [vmem:[%s2819_s4] sm:$0xf] }
 0x110   :  { %1060 = vmatprep.subr.bf16.mxu0 %v2096_v21  ;;  %1142 = vmatprep.subr.bf16.mxu1 %v2099_v22  ;;  %v340_v20 = vrot.slane %v335_v19, %v2457_v15  ;;  %v348_v21 = vrot.slane %v335_v19, %v63_v30  ;;  %v344_v22 = vrot.slane %v335_v19, %v59_v17 }
 0x113   :  { %1061 = vmatpush1.bf16.msra.mxu0 %v2094_v23  ;;  %1143 = vmatpush1.bf16.msra.mxu1 %v2097_v24  ;;  %v352_v23 = vrot.slane %v335_v19, %v67_v25 }
 0x114   :  { %1062 = vmatprep.subr.bf16.mxu0 %v2102_v26  ;;  %1144 = vmatprep.subr.bf16.mxu1 %v2105_v27 }
 0x117   :  { %1063 = vmatpush1.bf16.msra.mxu0 %v2100_v28  ;;  %1145 = vmatpush1.bf16.msra.mxu1 %v2103_v29 }
 0x118   :  { %1064 = vmatprep.subr.bf16.mxu0 %v2108_v31  ;;  %1146 = vmatprep.subr.bf16.mxu1 %v2111_v32 }
 0x11b   :  { %1065 = vmatpush1.bf16.msra.mxu0 %v2106_v33  ;;  %1147 = vmatpush1.bf16.msra.mxu1 %v2109_v34 }
 0x11c   :  { %1066 = vmatprep.subr.bf16.mxu0 %v2114_v37  ;;  %1148 = vmatprep.subr.bf16.mxu1 %v2117_v38 }
 0x11f   :  { %1067 = vmatpush1.bf16.msra.mxu0 %v2112_v39  ;;  %1149 = vmatpush1.bf16.msra.mxu1 %v2115_v16 }
 0x120   :  { %1068 = vmatprep.subr.bf16.mxu0 %v2120_v41  ;;  %1150 = vmatprep.subr.bf16.mxu1 %v2123_v42 }
 0x123   :  { %1069 = vmatpush1.bf16.msra.mxu0 %v2118_v43  ;;  %1151 = vmatpush1.bf16.msra.mxu1 %v2121_v36  ;;  %v2157_v43 = vld [vmem:[%s2818_s7 + $0x8] sm:$0xff]   ;;  %v2158_v36 = vld [vmem:[%s2818_s7 + $0x10] sm:$0xff]  }
 0x124   :  { %1832 = vmatprep.subr.bf16.mxu0 %v2124_v45  ;;  %1854 = vmatprep.subr.bf16.mxu1 %v2125_v46  ;;  %v2160_v45 = vld [vmem:[%s2818_s7 + $0x20] sm:$0xff]   ;;  %v2161_v46 = vld [vmem:[%s2818_s7 + $0x28] sm:$0xff]  }
 0x126   :  { %1071 = vmatmul.mubr.bf16.vlgmr.msra.gmra.mrb[0].mxu0 %v205_v49  ;;  %1153 = vmatmul.mubr.bf16.vlgmr.msra.gmra.mrb[8].mxu1 %v205_v49 }
 0x127   :  { %1833 = vmatpush3.bf16.msra.mxu0 %v2126_v47  ;;  %1855 = vmatpush3.bf16.msra.mxu1 %v2127_v48  ;;  %v2162_v47 = vld [vmem:[%s2818_s7 + $0x30] sm:$0xff]   ;;  %v2163_v48 = vld [vmem:[%s2818_s7 + $0x38] sm:$0xff]  }
 0x128   :  { %1834 = vmatprep.subr.bf16.mxu0 %v2128_v50  ;;  %1856 = vmatprep.subr.bf16.mxu1 %v2129_v51  ;;  %v1789_v51 = vld [vmem:[%s2820_s6] ss:$0 sm:$0xff] }
 0x12b   :  { %1835 = vmatpush3.bf16.msra.mxu0 %v2130_v52  ;;  %1857 = vmatpush3.bf16.msra.mxu1 %v2131_v53 }
 0x12c   :  { %1836 = vmatprep.subr.bf16.mxu0 %v2132_v54  ;;  %1858 = vmatprep.subr.bf16.mxu1 %v2133_v55 }
 0x12f   :  { %1837 = vmatpush3.bf16.msra.mxu0 %v2134_v56  ;;  %1859 = vmatpush3.bf16.msra.mxu1 %v2135_v57 }
 0x130   :  { %1838 = vmatprep.subr.bf16.mxu0 %v2136_v58  ;;  %1860 = vmatprep.subr.bf16.mxu1 %v2137_v59 }
 0x133   :  { %1839 = vmatpush3.bf16.msra.mxu0 %v2138_v60  ;;  %1861 = vmatpush3.bf16.msra.mxu1 %v2139_v61 }
 0x134   :  { %1840 = vmatprep.subr.bf16.mxu0 %v2140_v62  ;;  %1862 = vmatprep.subr.bf16.mxu1 %v2141_v63 }
 0x137   :  { %1841 = vmatpush3.bf16.msra.mxu0 %v2142_v0  ;;  %1863 = vmatpush3.bf16.msra.mxu1 %v2143_v1  ;;  %v16_v0 = vstv %s2821_s10  ;;  %v1626_v1 = vld [vmem:[%s2822_s9] sm:$0x1] }
 0x138   :  { %1842 = vmatprep.subr.bf16.mxu0 %v2144_v2  ;;  %1864 = vmatprep.subr.bf16.mxu1 %v2145_v3  ;;  %17 = vst [vmem:[#allocation2] sm:$0x1] %v16_v0  ;;  %v1627_v2 = vunpack.c.l.bf16 %v1626_v1  ;;  %v1822_v3 = vld [vmem:[%s2823_s8] ss:$0 sm:$0xff] }
 0x13b   :  { %1843 = vmatpush3.bf16.msra.mxu0 %v2146_v4  ;;  %1865 = vmatpush3.bf16.msra.mxu1 %v2147_v5 }
 0x13c   :  { %1844 = vmatprep.subr.bf16.mxu0 %v2148_v6  ;;  %1866 = vmatprep.subr.bf16.mxu1 %v2149_v7  ;;  %v1631_v7 = vrot.slane %v1627_v2, %v2457_v15 }
 0x13f   :  { %1845 = vmatpush3.bf16.msra.mxu0 %v2150_v8  ;;  %1867 = vmatpush3.bf16.msra.mxu1 %v2151_v9 }
 0x140   :  { %1846 = vmatprep.subr.bf16.mxu0 %v2152_v10  ;;  %1868 = vmatprep.subr.bf16.mxu1 %v2153_v11 }
 0x143   :  { %1847 = vmatpush3.bf16.msra.mxu0 %v2154_v12  ;;  %1869 = vmatpush3.bf16.msra.mxu1 %v2155_v13  ;;  %v1831_v13 = vld [vmem:[#allocation2] ss:$0 sm:$0xff] }
 0x144   :  { %1885 = vmatprep.subr.bf16.mxu0 %v2165_v18 }
 0x1f9   :  { %v1072_v24 = vpop.f32.mrb[0].mxu0  ;;  %v1154_v26 = vpop.f32.mrb[8].mxu1 }
 0x1fa   :  { %v1905_v27 = vadd.f32 %v1072_v24, %v340_v20  ;;  %v1907_v28 = vadd.f32 %v1154_v26, %v348_v21  ;;  %v1074_v29 = vpop.f32.mrb[1].mxu0  ;;  %v1156_v31 = vpop.f32.mrb[9].mxu1 }
 0x1fb   :  { %v1906_v32 = vadd.f32 %v1074_v29, %v344_v22  ;;  %v1908_v33 = vadd.f32 %v1156_v31, %v352_v23  ;;  %v1076_v34 = vpop.f32.mrb[2].mxu0  ;;  %v1158_v35 = vpop.f32.mrb[10].mxu1 }
 0x1fc   :  { %v1161_v37 = vmax.f32 %v1905_v27, 0.0  ;;  %v1163_v38 = vmax.f32 %v1907_v28, 0.0  ;;  %v1077_v39 = vpop.f32.mrb[3].mxu0  ;;  %v1159_v30 = vpop.f32.mrb[11].mxu1 }
 0x1fd   :  { %v1162_v16 = vmax.f32 %v1906_v32, 0.0  ;;  %v1164_v40 = vmax.f32 %v1908_v33, 0.0 }
 0x1fe   :  { %v1165_v25 = vpack.c.bf16 %v1161_v37, %v1161_v37  ;;  %v1167_v42 = vpack.c.bf16 %v1163_v38, %v1163_v38 }
 0x1ff   :  { %v1166_v17 = vpack.c.bf16 %v1162_v16, %v1162_v16  ;;  %v1168_v41 = vpack.c.bf16 %v1164_v40, %v1164_v40 }
 0x201   :  { %1464 = vmatprep.mubr.bf16.mxu0 %v1166_v17  ;;  %1504 = vmatprep.mubr.bf16.mxu1 %v1168_v41 }
 0x202   :  { %1465 = vmatmul.mubr.bf16.vlgmr.msra.gmra.mrb[4].mxu0 %v1165_v25  ;;  %1505 = vmatmul.mubr.bf16.vlgmr.msra.gmra.mrb[12].mxu1 %v1167_v42 }
 0x203   :  { %1886 = vmatpush3.bf16.msra.mxu0 %v2156_v14  ;;  %1901 = vmatprep.mubr.msk.bf16.mxu0 %vm2166_vm1, %v2165_v18 }
 0x204   :  { %1887 = vmatprep.subr.bf16.mxu0 %v2165_v18 }
 0x207   :  { %1888 = vmatpush3.bf16.msra.mxu0 %v2157_v43 }
 0x208   :  { %1889 = vmatprep.subr.bf16.mxu0 %v2165_v18 }
 0x20b   :  { %1890 = vmatpush3.bf16.msra.mxu0 %v2158_v36 }
 0x20c   :  { %1891 = vmatprep.subr.bf16.mxu0 %v2165_v18 }
 0x20f   :  { %1892 = vmatpush3.bf16.msra.mxu0 %v2159_v44 }
 0x210   :  { %1893 = vmatprep.subr.bf16.mxu0 %v2165_v18 }
 0x213   :  { %1894 = vmatpush3.bf16.msra.mxu0 %v2160_v45 }
 0x214   :  { %1895 = vmatprep.subr.bf16.mxu0 %v2165_v18 }
 0x217   :  { %1896 = vmatpush3.bf16.msra.mxu0 %v2161_v46 }
 0x218   :  { %1897 = vmatprep.subr.bf16.mxu0 %v2165_v18 }
 0x21b   :  { %1898 = vmatpush3.bf16.msra.mxu0 %v2162_v47 }
 0x21c   :  { %1899 = vmatprep.subr.bf16.mxu0 %v2165_v18 }
 0x21f   :  { %1900 = vmatpush3.bf16.msra.mxu0 %v2163_v48 }
 0x2d5   :  { %v1848_v49 = vpop.f32.mrb[4].mxu0  ;;  %v1870_v50 = vpop.f32.mrb[12].mxu1 }
 0x2d6   :  { %v1849_v52 = vpop.f32.mrb[5].mxu0  ;;  %v1871_v53 = vpop.f32.mrb[13].mxu1 }
 0x2d7   :  { %v1850_v54 = vadd.f32 %v1849_v52, %v1848_v49  ;;  %v1872_v55 = vadd.f32 %v1871_v53, %v1870_v50  ;;  %v1851_v56 = vpop.f32.mrb[6].mxu0  ;;  %v1873_v57 = vpop.f32.mrb[14].mxu1 }
 0x2d8   :  { %v1852_v58 = vpop.f32.mrb[7].mxu0  ;;  %v1874_v59 = vpop.f32.mrb[15].mxu1 }
 0x2d9   :  { %v1467_v60 = vadd.f32 %v1850_v54, %v1789_v51 }
 0x2db   :  { %v1507_v61 = vadd.f32 %v1872_v55, %v1467_v60 }
 0x2dd   :  { %v1512_v62 = vmax.f32 %v1507_v61, 0.0 }
 0x2df   :  { %v1513_v63 = vpack.c.bf16 %v1512_v62, %v1512_v62 }
 0x2e1   :  { %1902 = vmatmul.mubr.bf16.vlgmr.msra.gmra.mrb[8].mxu0 %v1513_v63 }
 0x3b4   :  { %v1619_v4 = vpop.f32.mrb[8].mxu0 }
 0x3b5   :  { %v1620_v5 = vadd.f32 %v1822_v3, %v1619_v4  ;;  %v1903_v6 = vpop.f32.mrb[9].mxu0 }
 0x3b6   :  { %v1622_v8 = vpop.f32.mrb[10].mxu0 }
 0x3b7   :  { %v1625_v9 = vmax.f32 %v1620_v5, 0.0  ;;  %v1904_v10 = vpop.f32.mrb[11].mxu0 }
 0x3b9   :  { %v1632_v11 = vmul.f32 %v1631_v7, %v1625_v9 }
 0x3bb   :  { %v1634_v12 = vsel %vm1633_vm2, %v1632_v11, 0.0 }
 0x3bc   :  { %1635 = vadd.xlane.f32.xlu0 %v1634_v12 }
 0x449   :  { %v1636_v18 = vpop.xlane.xlu0 %1635 }
 0x44a   :  { %v1644_v19 = vadd.f32 %v1831_v13, %v1636_v18 }
 0x44c   :  { %1646 = vst.msk [vmem:[%s2824_s11] sm:$0xff] %vm1645_vm3, %v1644_v19 }

</bundles_post_ra>
